<compile_context>
chip_gen: v7x
topology: tpu7x:2x2x1
jax: 0.10.0
libtpu: 0.0.40
codegen_flags: <defaults>
</compile_context>

<pallas_src>
import jax
import jax.numpy as jnp
from jax.experimental import pallas as pl
from jax.experimental.pallas import tpu as pltpu


def mlp_kernel(x_ref, w1_ref, b1_ref, w2_ref, b2_ref, o_ref):
    # f32 -> bf16 cast on the VPU (huge slack); single cast per tile.
    x = x_ref[...].astype(jnp.bfloat16)
    # fc1: (TM, D)bf16 @ (D, H)bf16 -> (TM, H) f32 accumulate on the MXU.
    h = jnp.dot(x, w1_ref[...], preferred_element_type=jnp.float32)
    h = jnp.maximum(h + b1_ref[...], 0.0)            # f32 bias + ReLU on the VPU
    # single bf16 cast right before the second MXU pass
    o = jnp.dot(h.astype(jnp.bfloat16), w2_ref[...],
                preferred_element_type=jnp.float32)
    # Un-padded (TM, O) store; masked lanes for O<128 are fine (store slot has slack).
    o_ref[...] = (o + b2_ref[...]).astype(o_ref.dtype)


def _choose_tm(B, cap=1024):
    """Batch tile: multiple of 8, <= cap.

    For large B, target an even grid-step count >= 4 so each v7x TensorCore
    gets >= 2 pipelined steps (balanced, pipelines stay full)."""
    def rup(n, m):
        return -(-n // m) * m

    if B <= 32:                         # tiny batch: single tile, no point splitting
        return min(rup(B, 8), cap)
    steps = max(4, -(-B // cap))        # >= 4 steps and tm <= cap
    if steps % 2:                       # even count keeps both v7x TCs balanced
        steps += 1
    tm = min(cap, rup(-(-B // steps), 8))
    return max(8, tm)


def _resident_spec(shape):
    """Resident operand (constant index_map): single-buffer when supported to
    skip the redundant second prologue DMA and its VMEM."""
    idx = lambda i: (0, 0)
    try:
        return pl.BlockSpec(shape, idx, pipeline_mode=pl.Buffered(1))
    except Exception:
        return pl.BlockSpec(shape, idx)


def prepare_params(w1, b1, w2, b2):
    """One-time (model-load) param prep, hoisted out of the forward path.

    w1: (D, H), w2: (H, O) -- i.e. PyTorch Linear weights pre-transposed to
    (in, out). Biases become (1, N) f32 rows; weights become bf16 MXU operands.
    """
    return (w1.astype(jnp.bfloat16),
            jnp.asarray(b1, jnp.float32).reshape(1, -1),
            w2.astype(jnp.bfloat16),
            jnp.asarray(b2, jnp.float32).reshape(1, -1))


def language_detection_forward(x, params, *, tm=None):
    """x: (B, D) f32; params from prepare_params. Returns (B, O) f32 logits,
    numerically fc2(relu(fc1(x))) with bf16 weights / f32 accumulation."""
    w1_b, b1_2d, w2_b, b2_2d = params
    B, D = x.shape
    H = w1_b.shape[1]
    O = w2_b.shape[1]

    if tm is None:
        tm = _choose_tm(B)
    tm = max(8, (tm // 8) * 8)                      # multiple of 8 sublanes
    grid = (pl.cdiv(B, tm),)                        # ragged last tile handled by Pallas

    cost = pl.CostEstimate(
        flops=int(2 * B * (D * H + H * O)),
        transcendentals=0,
        bytes_accessed=int(B * D * 4                # x (f32, read once by the kernel)
                           + D * H * 2 + H * O * 2  # bf16 weights
                           + H * 4 + O * 4          # f32 biases
                           + B * O * 4))            # f32 logits out

    # TODO(synk): on v7x, if a profile shows only one TensorCore busy, switch the
    # batch axis to pltpu.CORE_PARALLEL (or pl.core_map over a 2-core mesh).
    # TODO(synk): if these logits feed a softmax/argmax, fuse it into the epilogue.
    out = pl.pallas_call(
        mlp_kernel,
        out_shape=jax.ShapeDtypeStruct((B, O), jnp.float32),
        grid=grid,
        in_specs=[
            pl.BlockSpec((tm, D), lambda i: (i, 0)),  # x: tiled over batch (f32)
            _resident_spec((D, H)),                   # w1: resident bf16
            _resident_spec((1, H)),                   # b1: resident f32
            _resident_spec((H, O)),                   # w2: resident bf16
            _resident_spec((1, O)),                   # b2: resident f32
        ],
        out_specs=pl.BlockSpec((tm, O), lambda i: (i, 0)),  # un-padded logits
        compiler_params=pltpu.CompilerParams(
            dimension_semantics=("parallel",)),
        cost_estimate=cost,
    )(x, w1_b, b1_2d, w2_b, b2_2d)
    return out


if __name__ == "__main__":
    # Small shapes consistent with the module:
    #   input_dim = 256 (TF-IDF-ish feature dim), hidden = 128 (fixed by module),
    #   output_dim = 16 (number of language classes), batch = 8.
    B, input_dim, hidden, output_dim = 8, 256, 128, 16

    key = jax.random.PRNGKey(0)
    kx, kw1, kb1, kw2, kb2 = jax.random.split(key, 5)

    x = jax.random.normal(kx, (B, input_dim), dtype=jnp.float32)

    # PyTorch Linear weight shape is (out, in); kernel uses the transposed (in, out).
    w1_t = jax.random.normal(kw1, (hidden, input_dim), dtype=jnp.float32) * 0.02
    b1 = jax.random.normal(kb1, (hidden,), dtype=jnp.float32) * 0.01
    w2_t = jax.random.normal(kw2, (output_dim, hidden), dtype=jnp.float32) * 0.02
    b2 = jax.random.normal(kb2, (output_dim,), dtype=jnp.float32) * 0.01

    w1 = w1_t.T                      # (input_dim, hidden)
    w2 = w2_t.T                      # (hidden, output_dim)

    params = prepare_params(w1, b1, w2, b2)   # one-time, model-load-time prep
    out = language_detection_forward(x, params)
    out = jax.block_until_ready(out)

    # Pure-JAX f32 reference of the PyTorch forward pass.
    ref = jnp.maximum(x @ w1_t.T + b1, 0.0) @ w2_t.T + b2
    assert out.shape == (B, output_dim)
    # bf16 MXU weights with f32 accumulation -> small, bounded (~1e-2) deviation;
    # fine for classification logits, documented for f32-exact consumers.
    assert jnp.allclose(out, ref, atol=2e-2, rtol=2e-2), "mismatch vs reference"

    print("KERNEL_OK")
</pallas_src>

<mosaic_0001>
module attributes {stable_mosaic.version = 11 : i64} {
  func.func @mlp_kernel(%arg0: i32, %arg1: memref<8x256xf32, #tpu.memory_space<vmem>>, %arg2: memref<256x128xbf16, #tpu.memory_space<vmem>>, %arg3: memref<1x128xf32, #tpu.memory_space<vmem>>, %arg4: memref<128x16xbf16, #tpu.memory_space<vmem>>, %arg5: memref<1x16xf32, #tpu.memory_space<vmem>>, %arg6: memref<8x16xf32, #tpu.memory_space<vmem>>) attributes {dimension_semantics = [#tpu.dimension_semantics<parallel>], iteration_bounds = array<i64: 1>, scalar_prefetch = 0 : i64, scratch_operands = 0 : i64, tpu.core_type = #tpu.core_type<tc>, window_params = [{transform_indices = @transform_0, window_bounds = array<i64: 8, 256>}, {pipeline_mode = #tpu.pipeline_mode<synchronous>, transform_indices = @transform_1, window_bounds = array<i64: 256, 128>}, {pipeline_mode = #tpu.pipeline_mode<synchronous>, transform_indices = @transform_2, window_bounds = array<i64: 1, 128>}, {pipeline_mode = #tpu.pipeline_mode<synchronous>, transform_indices = @transform_3, window_bounds = array<i64: 128, 16>}, {pipeline_mode = #tpu.pipeline_mode<synchronous>, transform_indices = @transform_4, window_bounds = array<i64: 1, 16>}, {transform_indices = @transform_5, window_bounds = array<i64: 8, 16>}]} {
    %c0 = arith.constant 0 : index
    %c0_0 = arith.constant 0 : index
    %0 = vector.load %arg1[%c0, %c0_0] : memref<8x256xf32, #tpu.memory_space<vmem>>, vector<8x256xf32>
    %1 = arith.truncf %0 : vector<8x256xf32> to vector<8x256xbf16>
    %c0_1 = arith.constant 0 : index
    %c0_2 = arith.constant 0 : index
    %2 = vector.load %arg2[%c0_1, %c0_2] : memref<256x128xbf16, #tpu.memory_space<vmem>>, vector<256x128xbf16>
    %cst = arith.constant dense<0.000000e+00> : vector<8x128xf32>
    %3 = tpu.matmul %1, %2, %cst {dimension_numbers = #tpu.dot_dimension_numbers<[1], [0], [0], [1], [0, 0, 1, 1], [], []>} : vector<8x256xbf16>, vector<256x128xbf16>, vector<8x128xf32> -> vector<8x128xf32>
    %c0_3 = arith.constant 0 : index
    %c0_4 = arith.constant 0 : index
    %4 = vector.load %arg3[%c0_3, %c0_4] : memref<1x128xf32, #tpu.memory_space<vmem>>, vector<1x128xf32>
    %5 = vector.broadcast %4 : vector<1x128xf32> to vector<8x128xf32>
    %6 = arith.addf %3, %5 : vector<8x128xf32>
    %cst_5 = arith.constant 0.000000e+00 : f32
    %7 = vector.broadcast %cst_5 : f32 to vector<8x128xf32>
    %8 = arith.maximumf %6, %7 : vector<8x128xf32>
    %9 = arith.truncf %8 : vector<8x128xf32> to vector<8x128xbf16>
    %c0_6 = arith.constant 0 : index
    %c0_7 = arith.constant 0 : index
    %10 = vector.load %arg4[%c0_6, %c0_7] : memref<128x16xbf16, #tpu.memory_space<vmem>>, vector<128x16xbf16>
    %cst_8 = arith.constant dense<0.000000e+00> : vector<8x16xf32>
    %11 = tpu.matmul %9, %10, %cst_8 {dimension_numbers = #tpu.dot_dimension_numbers<[1], [0], [0], [1], [0, 0, 1, 1], [], []>} : vector<8x128xbf16>, vector<128x16xbf16>, vector<8x16xf32> -> vector<8x16xf32>
    %c0_9 = arith.constant 0 : index
    %c0_10 = arith.constant 0 : index
    %12 = vector.load %arg5[%c0_9, %c0_10] : memref<1x16xf32, #tpu.memory_space<vmem>>, vector<1x16xf32>
    %13 = vector.broadcast %12 : vector<1x16xf32> to vector<8x16xf32>
    %14 = arith.addf %11, %13 : vector<8x16xf32>
    %c0_11 = arith.constant 0 : index
    %c0_12 = arith.constant 0 : index
    %15 = vector.load %arg6[%c0_11, %c0_12] : memref<8x16xf32, #tpu.memory_space<vmem>>, vector<8x16xf32>
    tpu.vector_store %arg6[%c0_11, %c0_12], %14 {strides = array<i32>} : memref<8x16xf32, #tpu.memory_space<vmem>>, vector<8x16xf32>,
    return
  }
  func.func @transform_0(%arg0: i32) -> (i32, i32) {
    %c0_i32 = arith.constant 0 : i32
    %c0_i32_0 = arith.constant 0 : i32
    return %arg0, %c0_i32 : i32, i32
  }
  func.func @transform_1(%arg0: i32) -> (i32, i32) {
    %c0_i32 = arith.constant 0 : i32
    %c0_i32_0 = arith.constant 0 : i32
    %c0_i32_1 = arith.constant 0 : i32
    return %c0_i32, %c0_i32_0 : i32, i32
  }
  func.func @transform_2(%arg0: i32) -> (i32, i32) {
    %c0_i32 = arith.constant 0 : i32
    %c0_i32_0 = arith.constant 0 : i32
    %c0_i32_1 = arith.constant 0 : i32
    return %c0_i32, %c0_i32_0 : i32, i32
  }
  func.func @transform_3(%arg0: i32) -> (i32, i32) {
    %c0_i32 = arith.constant 0 : i32
    %c0_i32_0 = arith.constant 0 : i32
    %c0_i32_1 = arith.constant 0 : i32
    return %c0_i32, %c0_i32_0 : i32, i32
  }
  func.func @transform_4(%arg0: i32) -> (i32, i32) {
    %c0_i32 = arith.constant 0 : i32
    %c0_i32_0 = arith.constant 0 : i32
    %c0_i32_1 = arith.constant 0 : i32
    return %c0_i32, %c0_i32_0 : i32, i32
  }
  func.func @transform_5(%arg0: i32) -> (i32, i32) {
    %c0_i32 = arith.constant 0 : i32
    %c0_i32_0 = arith.constant 0 : i32
    return %arg0, %c0_i32 : i32, i32
  }
}

</mosaic_0001>

<bundles_post_ra>
// kernel: tpu_custom_call.1
= control target key start
LH: loop header
LB: loop body
LE: loop exit
PB: predicated region body
PF: predicated region fallthrough
CT: control target
= control target key end

     0   :  { %10 = vsyncpa [#allocation3], 0  ;;  %s605_s0 = inlined_call_operand.vmem [shape: f32[8,256], index: 0, kind: input, shape index: {}]   ;;  %s606_s1 = inlined_call_operand.hbm [shape: bf16[256,128], index: 1, kind: input, shape index: {}]   ;;  %s607_s2 = inlined_call_operand.vmem [shape: f32[1,128], index: 2, kind: input, shape index: {}]   ;;  %s608_s3 = inlined_call_operand.vmem [shape: bf16[128,16], index: 3, kind: input, shape index: {}]   ;;  %s609_s4 = inlined_call_operand.vmem [shape: f32[1,16], index: 4, kind: input, shape index: {}]   ;;  %s610_s5 = inlined_call_operand.hbm [shape: f32[8,16], index: 5, kind: output, shape index: {}]  }
   0x1   :  { %11 = vsyncpa [#allocation4], 0  ;;  %s500_s18 = smov [#allocation2]   ;;  %s452_s22 = scalar_lea.hbm %s606_s1, 2048 }
   0x2   :  { %s19_s19 = sshll.u32 %s500_s18, 4  ;;  %p453_p0 = scmp.ne.s32.totalorder %s606_s1, %s452_s22  ;;  %s20_s19 = int_to_ptr.vmem [resolvable:$true] %s19_s19 }
   0x3   :  { %p456_p1 = scmp.lt.u32.totalorder %s452_s22, %s606_s1 }
   0x5   :  { %p458_p2 = pnand %p456_p1, %p453_p0 }
   0x7   :  { %461 = shalt.err (!%p458_p2)
}
   0x8   :  { %s462_s27 = scalar_lea.vmem %s20_s19, 2048  ;;  %p467_p4 = scmp.lt.s32.totalorder %s20_s19, %s20_s19 }
   0x9   :  { %p463_p3 = scmp.ne.s32.totalorder %s20_s19, %s462_s27  ;;  %p468_p5 = scmp.lt.s32.totalorder %s462_s27, %s462_s27 }
   0xb   :  { %p469_p6 = por %p468_p5, %p467_p4 }
   0xd   :  { %p470_p7 = pnand %p469_p6, %p463_p3 }
   0xf   :  { %473 = shalt.err (!%p470_p7)
}
  0x10   :  { %s501_s28 = smov 64   ;;  %s502_s29 = smov 4  }
  0x11   :  { %25 = dma.hbm_to_vmem [thread:$0]  %s606_s1, 2048, %s20_s19, [#allocation3], %s501_s28, %s501_s28, %s502_s29  }
  0x12   :  { %496 = dma.done.wait [#allocation3], 2048  }
  0x13   :  { %497 = vsyncadd [#allocation3], 4294965248  ;;  %v503_v0 = vmov 0.0   ;;  %v428_v1 = vld [vmem:[#allocation2 + $0x40] sm:$0xff]   ;;  %v430_v3 = vld [vmem:[#allocation2 + $0x48] sm:$0xff]   ;;  %vm504_vm0 = vmmov 0  }
  0x14   :  { %402 = vmatprep.subr.bf16.mxu1 %v503_v0  ;;  %v429_v2 = vld [vmem:[#allocation2] sm:$0xff]   ;;  %371 = vmatprep.subr.bf16.mxu0 %v428_v1  ;;  %v431_v4 = vld [vmem:[#allocation2 + $0x8] sm:$0xff]   ;;  %v432_v5 = vld [vmem:[#allocation2 + $0x50] sm:$0xff]   ;;  %vm328_vm1 = vcmask 130048  }
  0x15   :  { %372 = vmatpush3.bf16.msra.mxu0 %v429_v2  ;;  %v433_v6 = vld [vmem:[#allocation2 + $0x10] sm:$0xff]   ;;  %v434_v7 = vld [vmem:[#allocation2 + $0x58] sm:$0xff]   ;;  %v436_v9 = vld [vmem:[#allocation2 + $0x60] sm:$0xff]   ;;  %418 = vmatprep.mubr.msk.bf16.mxu1 %vm504_vm0, %v503_v0 }
  0x16   :  { %373 = vmatprep.subr.bf16.mxu0 %v430_v3  ;;  %v435_v8 = vld [vmem:[#allocation2 + $0x18] sm:$0xff]   ;;  %v437_v10 = vld [vmem:[#allocation2 + $0x20] sm:$0xff]   ;;  %v438_v11 = vld [vmem:[#allocation2 + $0x68] sm:$0xff]  }
  0x17   :  { %v37_v12 = vld [vmem:[%s605_s0 + $0x8] sm:$0xff]  ;;  %v444_v14 = vld [vmem:[%s608_s3] sm:$0xff]   ;;  %v440_v16 = vld [vmem:[#allocation2 + $0x70] sm:$0xff]  }
  0x18   :  { %v39_v13 = vpack.c.bf16 %v37_v12, %v37_v12  ;;  %v439_v15 = vld [vmem:[#allocation2 + $0x28] sm:$0xff]   ;;  %403 = vmatpush3.bf16.msra.mxu1 %v444_v14  ;;  %v441_v18 = vld [vmem:[#allocation2 + $0x30] sm:$0xff]   ;;  %v442_v19 = vld [vmem:[#allocation2 + $0x78] sm:$0xff]  }
  0x19   :  { %374 = vmatpush3.bf16.msra.mxu0 %v431_v4  ;;  %v445_v17 = vld [vmem:[%s608_s3 + $0x8] sm:$0xff]   ;;  %404 = vmatprep.subr.bf16.mxu1 %v503_v0  ;;  %v446_v20 = vld [vmem:[%s608_s3 + $0x10] sm:$0xff]   ;;  %v443_v21 = vld [vmem:[#allocation2 + $0x38] sm:$0xff]  }
  0x1a   :  { %375 = vmatprep.subr.bf16.mxu0 %v432_v5  ;;  %207 = vmatprep.mubr.bf16.mxu0 %v39_v13  ;;  %v36_v22 = vld [vmem:[%s605_s0] sm:$0xff]  ;;  %v447_v23 = vld [vmem:[%s608_s3 + $0x18] sm:$0xff]   ;;  %v449_v26 = vld [vmem:[%s608_s3 + $0x28] sm:$0xff]  }
  0x1b   :  { %v38_v24 = vpack.c.bf16 %v36_v22, %v36_v22  ;;  %v448_v25 = vld [vmem:[%s608_s3 + $0x20] sm:$0xff]   ;;  %v450_v27 = vld [vmem:[%s608_s3 + $0x30] sm:$0xff]   ;;  %v451_v28 = vld [vmem:[%s608_s3 + $0x38] sm:$0xff]   ;;  %s505_s3 = smov [#allocation5]  }
  0x1c   :  { %405 = vmatpush3.bf16.msra.mxu1 %v445_v17  ;;  %v345_v30 = vld [vmem:[%s607_s2] ss:$0 sm:$0xff]  ;;  %s336_s29 = sshll.u32 %s505_s3, 4  ;;  %s337_s29 = int_to_ptr.vmem [resolvable:$true] %s336_s29 }
  0x1d   :  { %376 = vmatpush3.bf16.msra.mxu0 %v433_v6  ;;  %406 = vmatprep.subr.bf16.mxu1 %v503_v0  ;;  %v362_v38 = vld [vmem:[%s609_s4] ss:$0 sm:$0xff]  ;;  %s474_s2 = scalar_lea.vmem %s337_s29, 128  ;;  %p479_p9 = scmp.lt.s32.totalorder %s337_s29, %s337_s29 }
  0x1e   :  { %377 = vmatprep.subr.bf16.mxu0 %v434_v7  ;;  %p475_p8 = scmp.ne.s32.totalorder %s337_s29, %s474_s2  ;;  %p480_p10 = scmp.lt.s32.totalorder %s474_s2, %s474_s2 }
  0x20   :  { %407 = vmatpush3.bf16.msra.mxu1 %v446_v20  ;;  %p481_p11 = por %p480_p10, %p479_p9 }
  0x21   :  { %378 = vmatpush3.bf16.msra.mxu0 %v435_v8  ;;  %408 = vmatprep.subr.bf16.mxu1 %v503_v0 }
  0x22   :  { %379 = vmatprep.subr.bf16.mxu0 %v436_v9  ;;  %p482_p12 = pnand %p481_p11, %p475_p8 }
  0x24   :  { %409 = vmatpush3.bf16.msra.mxu1 %v447_v23 }
  0x25   :  { %380 = vmatpush3.bf16.msra.mxu0 %v437_v10  ;;  %410 = vmatprep.subr.bf16.mxu1 %v503_v0 }
  0x26   :  { %381 = vmatprep.subr.bf16.mxu0 %v438_v11 }
  0x28   :  { %411 = vmatpush3.bf16.msra.mxu1 %v448_v25 }
  0x29   :  { %382 = vmatpush3.bf16.msra.mxu0 %v439_v15  ;;  %412 = vmatprep.subr.bf16.mxu1 %v503_v0 }
  0x2a   :  { %383 = vmatprep.subr.bf16.mxu0 %v440_v16 }
  0x2c   :  { %413 = vmatpush3.bf16.msra.mxu1 %v449_v26 }
  0x2d   :  { %384 = vmatpush3.bf16.msra.mxu0 %v441_v18  ;;  %414 = vmatprep.subr.bf16.mxu1 %v503_v0 }
  0x2e   :  { %385 = vmatprep.subr.bf16.mxu0 %v442_v19 }
  0x30   :  { %415 = vmatpush3.bf16.msra.mxu1 %v450_v27 }
  0x31   :  { %386 = vmatpush3.bf16.msra.mxu0 %v443_v21  ;;  %416 = vmatprep.subr.bf16.mxu1 %v503_v0 }
  0x34   :  { %208 = vmatmul.mubr.bf16.vlgmr.msra.gmra.mrb[0].mxu0 %v38_v24  ;;  %417 = vmatpush3.bf16.msra.mxu1 %v451_v28 }
 0x107   :  { %v387_v29 = vpop.f32.mrb[0].mxu0 }
 0x108   :  { %v388_v31 = vpop.f32.mrb[1].mxu0 }
 0x109   :  { %v389_v32 = vadd.f32 %v388_v31, %v387_v29  ;;  %v390_v33 = vpop.f32.mrb[2].mxu0 }
 0x10a   :  { %v391_v34 = vpop.f32.mrb[3].mxu0 }
 0x10b   :  { %v210_v35 = vadd.f32 %v389_v32, %v345_v30 }
 0x10d   :  { %v215_v36 = vmax.f32 %v210_v35, 0.0 }
 0x10f   :  { %v216_v37 = vpack.c.bf16 %v215_v36, %v215_v36 }
 0x111   :  { %419 = vmatmul.mubr.bf16.vlgmr.msra.gmra.mrb[0].mxu1 %v216_v37 }
 0x1e4   :  { %v322_v39 = vpop.f32.mrb[0].mxu1 }
 0x1e5   :  { %v323_v40 = vadd.f32 %v362_v38, %v322_v39  ;;  %v420_v41 = vpop.f32.mrb[1].mxu1 }
 0x1e6   :  { %v325_v42 = vpop.f32.mrb[2].mxu1 }
 0x1e7   :  { %v421_v43 = vpop.f32.mrb[3].mxu1  ;;  %329 = vst.msk [vmem:[#allocation5] sm:$0xff] %vm328_vm1, %v323_v40 }
 0x1e8   :  { %485 = shalt.err (!%p482_p12)
}
 0x1e9   :  { %s486_s4 = scalar_lea.hbm %s610_s5, 128 }
 0x1ea   :  { %p487_p13 = scmp.ne.s32.totalorder %s610_s5, %s486_s4  ;;  %p490_p0 = scmp.lt.u32.totalorder %s486_s4, %s610_s5 }
 0x1ec   :  { %p492_p1 = pnand %p490_p0, %p487_p13 }
 0x1ee   :  { %495 = shalt.err (!%p492_p1)
}
 0x1ef   :  { %339 = dma.vmem_to_hbm [thread:$0]  %s337_s29, 128, %s610_s5, [#allocation4]  }
 0x1f0   :  { %498 = dma.done.wait [#allocation4], 128  }
 0x1f1   :  { %499 = vsyncadd [#allocation4], 4294967168 }
 0x1f2   :  { %343 = vsyncpa [#allocation3], 1 }
 0x1f3   :  { %344 = vsyncpa [#allocation4], 1 }

</bundles_post_ra>
